<compile_context>
chip_gen: v7x
topology: tpu7x:2x2x1
jax: 0.10.0
libtpu: 0.0.40
codegen_flags: <defaults>
</compile_context>

<pallas_src>
import jax
import jax.numpy as jnp
from jax.experimental import pallas as pl
from jax.experimental.pallas import tpu as pltpu


def mlp_kernel(x_ref, w1_ref, b1_ref, w2_ref, b2_ref, w3_ref, b3_ref, o_ref):
    # Layer 1: cast MXU operands to bf16 in-kernel, accumulate in f32.
    x = x_ref[...].astype(jnp.bfloat16)                       # (tm, K)
    w1 = w1_ref[...].astype(jnp.bfloat16)                     # (K, H)
    h1 = jnp.dot(x, w1, preferred_element_type=jnp.float32)   # (tm, H) f32
    h1 = jnp.maximum(h1 + b1_ref[...], 0.0)

    # Layer 2.
    h2 = jnp.dot(h1.astype(jnp.bfloat16), w2_ref[...].astype(jnp.bfloat16),
                 preferred_element_type=jnp.float32)          # (tm, H) f32
    h2 = jnp.maximum(h2 + b2_ref[...], 0.0)

    # Output head (H -> 1), produced directly as a lane-dense (1, tm) row:
    # contract the last dims of w3 (1, H) and h2 (tm, H) (MXU "trans_b" pattern).
    head = jax.lax.dot_general(
        w3_ref[...].astype(jnp.bfloat16), h2.astype(jnp.bfloat16),
        dimension_numbers=(((1,), (1,)), ((), ())),
        preferred_element_type=jnp.float32)                   # (1, tm) f32

    # Fold the scalar output bias in-kernel (SMEM scalar) -> packed f32 store.
    o_ref[...] = head + b3_ref[0, 0]


def mlp_forward(x, w1, b1, w2, b2, w3, b3, *,
                block_batch=1024, single_block_max=128):
    B, K = x.shape
    H = w1.shape[1]

    # Cheap metadata-only reshapes; all heavy data (x, W1, W2) is consumed raw
    # by the kernel (casts happen in-kernel).
    b1r = b1.reshape(1, H).astype(jnp.float32)
    b2r = b2.reshape(1, H).astype(jnp.float32)
    w3r = w3.reshape(1, H).astype(jnp.float32)     # head weights as an f32 row
    b3r = b3.reshape(1, 1).astype(jnp.float32)     # scalar bias -> SMEM

    smem = pl.BlockSpec(memory_space=pltpu.MemorySpace.SMEM)

    if B <= single_block_max:
        # Single block: no grid -> no pipeline machinery, whole problem in VMEM.
        vmem = pl.BlockSpec(memory_space=pltpu.MemorySpace.VMEM)
        packed = pl.pallas_call(
            mlp_kernel,
            out_shape=jax.ShapeDtypeStruct((1, B), jnp.float32),
            in_specs=[vmem, vmem, vmem, vmem, vmem, vmem, smem],
            out_specs=vmem,
        )(x, w1, b1r, w2, b2r, w3r, b3r)
    else:
        # Batch-tiled path: weights/biases stay resident (constant index_maps),
        # activations stream in large blocks. Tile is chosen so there are always
        # >= 2 blocks (v7x megacore) and is lane-aligned (128) for the packed
        # (1, tm) output store.
        tm = min(block_batch, pl.cdiv(B, 2))
        tm = pl.cdiv(tm, 128) * 128
        Bp = pl.cdiv(B, tm) * tm
        xg = x if Bp == B else jnp.pad(x, ((0, Bp - B), (0, 0)))
        packed = pl.pallas_call(
            mlp_kernel,
            out_shape=jax.ShapeDtypeStruct((1, Bp), jnp.float32),
            grid=(Bp // tm,),
            in_specs=[
                pl.BlockSpec((tm, K), lambda i: (i, 0)),   # x block (raw f32)
                pl.BlockSpec((K, H), lambda i: (0, 0)),    # W1 (resident)
                pl.BlockSpec((1, H), lambda i: (0, 0)),    # b1
                pl.BlockSpec((H, H), lambda i: (0, 0)),    # W2 (resident)
                pl.BlockSpec((1, H), lambda i: (0, 0)),    # b2
                pl.BlockSpec((1, H), lambda i: (0, 0)),    # w3 row
                smem,                                      # b3 scalar
            ],
            out_specs=pl.BlockSpec((1, tm), lambda i: (0, i)),
            compiler_params=pltpu.CompilerParams(
                dimension_semantics=("parallel",)),
        )(xg, w1, b1r, w2, b2r, w3r, b3r)

    # Packed row -> (B, 1) column; b3 is already applied in-kernel.
    return packed[0, :B].reshape(B, 1)


def ref_forward(x, w1, b1, w2, b2, w3, b3):
    # Pure-JAX reference mirroring the kernel's numerics (bf16 MXU operands,
    # f32 accumulation everywhere).
    xb = x.astype(jnp.bfloat16)
    w1b = w1.astype(jnp.bfloat16)
    w2b = w2.astype(jnp.bfloat16)
    w3b = w3.reshape(1, -1).astype(jnp.bfloat16)
    h1 = jnp.maximum(
        jnp.dot(xb, w1b, preferred_element_type=jnp.float32) + b1, 0.0)
    h2 = jnp.maximum(
        jnp.dot(h1.astype(jnp.bfloat16), w2b,
                preferred_element_type=jnp.float32) + b2, 0.0)
    head = jnp.dot(h2.astype(jnp.bfloat16), w3b.T,
                   preferred_element_type=jnp.float32)
    return head + b3.reshape(1, 1)


def ref_forward_f32(x, w1, b1, w2, b2, w3, b3):
    # Full-precision reference matching the original torch Model (f32 end to end).
    h1 = jnp.maximum(x @ w1 + b1, 0.0)
    h2 = jnp.maximum(h1 @ w2 + b2, 0.0)
    return h2 @ w3.reshape(-1, 1) + b3.reshape(1, 1)


def init_params(key, input_dimensions, size=128):
    # Deterministic init mirroring torch.nn.Linear shapes (weights stored (in, out)).
    ks = jax.random.split(key, 6)

    def lin(kw, kb, fan_in, fan_out):
        bound = 1.0 / jnp.sqrt(fan_in)
        w = jax.random.uniform(kw, (fan_in, fan_out), jnp.float32, -bound, bound)
        b = jax.random.uniform(kb, (fan_out,), jnp.float32, -bound, bound)
        return w, b

    w1, b1 = lin(ks[0], ks[1], input_dimensions, size)
    w2, b2 = lin(ks[2], ks[3], size, size)
    w3, b3 = lin(ks[4], ks[5], size, 1)
    return w1, b1, w2, b2, w3, b3


if __name__ == "__main__":
    key = jax.random.PRNGKey(0)
    kx, kp, kx2 = jax.random.split(key, 3)

    batch, input_dimensions, size = 16, 32, 128
    x = jax.random.normal(kx, (batch, input_dimensions), jnp.float32)
    params = init_params(kp, input_dimensions, size)

    fwd = jax.jit(mlp_forward)

    # Small batch -> grid-free single-block path.
    out = jax.block_until_ready(fwd(x, *params))
    assert out.shape == (batch, 1)
    assert jnp.allclose(out, ref_forward(x, *params), atol=5e-3, rtol=5e-3)
    assert jnp.allclose(out, ref_forward_f32(x, *params), atol=5e-2, rtol=5e-2)

    # Larger batch -> batch-tiled "parallel" path (>= 2 grid blocks).
    big_batch = 512
    x_big = jax.random.normal(kx2, (big_batch, input_dimensions), jnp.float32)
    out_big = jax.block_until_ready(fwd(x_big, *params))
    assert out_big.shape == (big_batch, 1)
    assert jnp.allclose(out_big, ref_forward(x_big, *params), atol=5e-3, rtol=5e-3)
    assert jnp.allclose(out_big, ref_forward_f32(x_big, *params), atol=5e-2, rtol=5e-2)

    print("KERNEL_OK")
</pallas_src>

<mosaic_0001>
module attributes {stable_mosaic.version = 11 : i64} {
  func.func @mlp_kernel(%arg0: memref<16x32xf32, #tpu.memory_space<vmem>>, %arg1: memref<32x128xf32, #tpu.memory_space<vmem>>, %arg2: memref<1x128xf32, #tpu.memory_space<vmem>>, %arg3: memref<128x128xf32, #tpu.memory_space<vmem>>, %arg4: memref<1x128xf32, #tpu.memory_space<vmem>>, %arg5: memref<1x128xf32, #tpu.memory_space<vmem>>, %arg6: memref<1x1xf32, #tpu.memory_space<smem>>, %arg7: memref<1x16xf32, #tpu.memory_space<vmem>>) attributes {dimension_semantics = [], scalar_prefetch = 0 : i64, scratch_operands = 0 : i64, tpu.core_type = #tpu.core_type<tc>} {
    %c0 = arith.constant 0 : index
    %c0_0 = arith.constant 0 : index
    %0 = vector.load %arg0[%c0, %c0_0] : memref<16x32xf32, #tpu.memory_space<vmem>>, vector<16x32xf32>
    %1 = arith.truncf %0 : vector<16x32xf32> to vector<16x32xbf16>
    %c0_1 = arith.constant 0 : index
    %c0_2 = arith.constant 0 : index
    %2 = vector.load %arg1[%c0_1, %c0_2] : memref<32x128xf32, #tpu.memory_space<vmem>>, vector<32x128xf32>
    %3 = arith.truncf %2 : vector<32x128xf32> to vector<32x128xbf16>
    %cst = arith.constant dense<0.000000e+00> : vector<16x128xf32>
    %4 = tpu.matmul %1, %3, %cst {dimension_numbers = #tpu.dot_dimension_numbers<[1], [0], [0], [1], [0, 0, 1, 1], [], []>} : vector<16x32xbf16>, vector<32x128xbf16>, vector<16x128xf32> -> vector<16x128xf32>
    %c0_3 = arith.constant 0 : index
    %c0_4 = arith.constant 0 : index
    %5 = vector.load %arg2[%c0_3, %c0_4] : memref<1x128xf32, #tpu.memory_space<vmem>>, vector<1x128xf32>
    %6 = vector.broadcast %5 : vector<1x128xf32> to vector<16x128xf32>
    %7 = arith.addf %4, %6 : vector<16x128xf32>
    %cst_5 = arith.constant 0.000000e+00 : f32
    %8 = vector.broadcast %cst_5 : f32 to vector<16x128xf32>
    %9 = arith.maximumf %7, %8 : vector<16x128xf32>
    %10 = arith.truncf %9 : vector<16x128xf32> to vector<16x128xbf16>
    %c0_6 = arith.constant 0 : index
    %c0_7 = arith.constant 0 : index
    %11 = vector.load %arg3[%c0_6, %c0_7] : memref<128x128xf32, #tpu.memory_space<vmem>>, vector<128x128xf32>
    %12 = arith.truncf %11 : vector<128x128xf32> to vector<128x128xbf16>
    %cst_8 = arith.constant dense<0.000000e+00> : vector<16x128xf32>
    %13 = tpu.matmul %10, %12, %cst_8 {dimension_numbers = #tpu.dot_dimension_numbers<[1], [0], [0], [1], [0, 0, 1, 1], [], []>} : vector<16x128xbf16>, vector<128x128xbf16>, vector<16x128xf32> -> vector<16x128xf32>
    %c0_9 = arith.constant 0 : index
    %c0_10 = arith.constant 0 : index
    %14 = vector.load %arg4[%c0_9, %c0_10] : memref<1x128xf32, #tpu.memory_space<vmem>>, vector<1x128xf32>
    %15 = vector.broadcast %14 : vector<1x128xf32> to vector<16x128xf32>
    %16 = arith.addf %13, %15 : vector<16x128xf32>
    %cst_11 = arith.constant 0.000000e+00 : f32
    %17 = vector.broadcast %cst_11 : f32 to vector<16x128xf32>
    %18 = arith.maximumf %16, %17 : vector<16x128xf32>
    %c0_12 = arith.constant 0 : index
    %c0_13 = arith.constant 0 : index
    %19 = vector.load %arg5[%c0_12, %c0_13] : memref<1x128xf32, #tpu.memory_space<vmem>>, vector<1x128xf32>
    %20 = arith.truncf %19 : vector<1x128xf32> to vector<1x128xbf16>
    %21 = arith.truncf %18 : vector<16x128xf32> to vector<16x128xbf16>
    %cst_14 = arith.constant dense<0.000000e+00> : vector<1x16xf32>
    %22 = tpu.matmul %20, %21, %cst_14 {dimension_numbers = #tpu.dot_dimension_numbers<[1], [1], [0], [0], [0, 0, 1, 0], [], []>} : vector<1x128xbf16>, vector<16x128xbf16>, vector<1x16xf32> -> vector<1x16xf32>
    %c0_15 = arith.constant 0 : index
    %c0_16 = arith.constant 0 : index
    %23 = memref.load %arg6[%c0_15, %c0_16] : memref<1x1xf32, #tpu.memory_space<smem>>
    %24 = vector.broadcast %23 : f32 to vector<1x16xf32>
    %25 = arith.addf %22, %24 : vector<1x16xf32>
    %c0_17 = arith.constant 0 : index
    %c0_18 = arith.constant 0 : index
    %26 = vector.load %arg7[%c0_17, %c0_18] : memref<1x16xf32, #tpu.memory_space<vmem>>, vector<1x16xf32>
    tpu.vector_store %arg7[%c0_17, %c0_18], %25 {strides = array<i32>} : memref<1x16xf32, #tpu.memory_space<vmem>>, vector<1x16xf32>,
    return
  }
}

</mosaic_0001>

<bundles_post_ra>
// kernel: mlp_forward.1
= control target key start
LH: loop header
LB: loop body
LE: loop exit
PB: predicated region body
PF: predicated region fallthrough
CT: control target
= control target key end

     0   :  { %13 = vsyncpa [#allocation4], 0  ;;  %s492_s0 = inlined_call_operand.vmem [shape: f32[16,32], index: 0, kind: input, shape index: {}]   ;;  %s493_s1 = inlined_call_operand.hbm [shape: f32[32,128], index: 1, kind: input, shape index: {}]   ;;  %s494_s2 = inlined_call_operand.vmem [shape: f32[1,128], index: 2, kind: input, shape index: {}]   ;;  %s495_s3 = inlined_call_operand.hbm [shape: f32[128,128], index: 3, kind: input, shape index: {}]   ;;  %s496_s4 = inlined_call_operand.vmem [shape: f32[1,128], index: 4, kind: input, shape index: {}]   ;;  %s497_s5 = inlined_call_operand.vmem [shape: f32[1,128], index: 5, kind: input, shape index: {}]   ;;  %s498_s6 = inlined_call_operand.<no memory space> [shape: f32[1,1], index: 6, kind: input, shape index: {}]   ;;  %s499_s7 = inlined_call_operand.hbm [shape: f32[1,16], index: 7, kind: output, shape index: {}]  }
   0x1   :  { %14 = vsyncpa [#allocation7], 0 }
   0x2   :  { %15 = vsyncpa [#allocation5], 0  ;;  %s388_s24 = smov [#allocation3]   ;;  %s316_s28 = scalar_lea.hbm %s493_s1, 512 }
   0x3   :  { %s23_s25 = sshll.u32 %s388_s24, 4  ;;  %p317_p0 = scmp.ne.s32.totalorder %s493_s1, %s316_s28  ;;  %s24_s25 = int_to_ptr.vmem [resolvable:$true] %s23_s25 }
   0x4   :  { %p320_p1 = scmp.lt.u32.totalorder %s316_s28, %s493_s1 }
   0x6   :  { %p322_p2 = pnand %p320_p1, %p317_p0 }
   0x8   :  { %325 = shalt.err (!%p322_p2)
}
   0x9   :  { %s326_s10 = scalar_lea.vmem %s24_s25, 512  ;;  %p331_p4 = scmp.lt.s32.totalorder %s24_s25, %s24_s25 }
   0xa   :  { %p327_p3 = scmp.ne.s32.totalorder %s24_s25, %s326_s10  ;;  %p332_p5 = scmp.lt.s32.totalorder %s326_s10, %s326_s10 }
   0xc   :  { %p333_p6 = por %p332_p5, %p331_p4 }
   0xe   :  { %p334_p7 = pnand %p333_p6, %p327_p3 }
  0x10   :  { %337 = shalt.err (!%p334_p7)
}
  0x11   :  { %s389_s11 = smov 128   ;;  %s390_s12 = smov 8  }
  0x12   :  { %29 = dma.hbm_to_vmem [thread:$0]  %s493_s1, 512, %s24_s25, [#allocation4], %s389_s11, %s389_s11, %s390_s12  }
  0x13   :  { %s391_s15 = smov [#allocation6]   ;;  %s338_s19 = scalar_lea.hbm %s495_s3, 2048 }
  0x14   :  { %s37_s16 = sshll.u32 %s391_s15, 4  ;;  %p339_p8 = scmp.ne.s32.totalorder %s495_s3, %s338_s19  ;;  %s38_s16 = int_to_ptr.vmem [resolvable:$true] %s37_s16 }
  0x15   :  { %p342_p9 = scmp.lt.u32.totalorder %s338_s19, %s495_s3 }
  0x17   :  { %p344_p10 = pnand %p342_p9, %p339_p8 }
  0x19   :  { %347 = shalt.err (!%p344_p10)
}
  0x1a   :  { %s348_s24 = scalar_lea.vmem %s38_s16, 2048  ;;  %p353_p12 = scmp.lt.s32.totalorder %s38_s16, %s38_s16 }
  0x1b   :  { %p349_p11 = scmp.ne.s32.totalorder %s38_s16, %s348_s24  ;;  %p354_p13 = scmp.lt.s32.totalorder %s348_s24, %s348_s24 }
  0x1d   :  { %p355_p0 = por %p354_p13, %p353_p12 }
  0x1f   :  { %p356_p1 = pnand %p355_p0, %p349_p11 }
  0x21   :  { %359 = shalt.err (!%p356_p1)
}
  0x22   :  { %43 = dma.hbm_to_vmem [thread:$0]  %s495_s3, 2048, %s38_s16, [#allocation7], %s389_s11, %s389_s11, %s390_s12  }
  0x23   :  { %382 = dma.done.wait [#allocation4], 512  }
  0x24   :  { %383 = vsyncadd [#allocation4], 4294966784 }
  0x25   :  { %384 = dma.done.wait [#allocation7], 2048  }
  0x26   :  { %385 = vsyncadd [#allocation7], 4294965248  ;;  %v392_v0 = vmov 0.0   ;;  %vm393_vm0 = vmmov 0   ;;  %v60_v1 = vld [vmem:[#allocation3] sm:$0xff]  ;;  %v61_v2 = vld [vmem:[#allocation3 + $0x8] sm:$0xff]  ;;  %v199_v56 = vstv %s498_s6 }
  0x27   :  { %275 = vmatprep.subr.bf16.mxu0 %v392_v0  ;;  %279 = vmatprep.mubr.msk.bf16.mxu0 %vm393_vm0, %v392_v0  ;;  %v62_v3 = vld [vmem:[#allocation3 + $0x10] sm:$0xff]  ;;  %v64_v4 = vpack.c.bf16 %v61_v2, %v60_v1  ;;  %v63_v5 = vld [vmem:[#allocation3 + $0x18] sm:$0xff]  ;;  %v121_v6 = vld [vmem:[#allocation6] sm:$0xff]  ;;  %vm73_vm1 = vcmask 261120   ;;  %vm240_vm2 = vcmask 122880  }
  0x28   :  { %283 = vmatprep.subr.bf16.mxu1 %v392_v0  ;;  %299 = vmatprep.mubr.msk.bf16.mxu1 %vm393_vm0, %v392_v0  ;;  %v122_v7 = vld [vmem:[#allocation6 + $0x8] sm:$0xff]  ;;  %v123_v8 = vld [vmem:[#allocation6 + $0x10] sm:$0xff]  ;;  %v65_v9 = vpack.c.bf16 %v63_v5, %v62_v3  ;;  %v57_v10 = vld [vmem:[%s492_s0] sm:$0xff] }
  0x29   :  { %276 = vmatpush3.bf16.msra.mxu0 %v64_v4  ;;  %v58_v11 = vld [vmem:[%s492_s0 + $0x8] sm:$0xff]  ;;  %v137_v12 = vpack.c.bf16 %v122_v7, %v121_v6  ;;  %v124_v13 = vld [vmem:[#allocation6 + $0x18] sm:$0xff]  ;;  %v125_v16 = vld [vmem:[#allocation6 + $0x20] sm:$0xff] }
  0x2a   :  { %277 = vmatprep.subr.bf16.mxu0 %v392_v0  ;;  %v138_v14 = vpack.c.bf16 %v124_v13, %v123_v8  ;;  %v59_v15 = vpack.c.bf16 %v58_v11, %v57_v10  ;;  %v126_v17 = vld [vmem:[#allocation6 + $0x28] sm:$0xff]  ;;  %v127_v19 = vld [vmem:[#allocation6 + $0x30] sm:$0xff]  ;;  %v128_v20 = vld [vmem:[#allocation6 + $0x38] sm:$0xff] }
  0x2b   :  { %284 = vmatpush3.bf16.msra.mxu1 %v137_v12  ;;  %v139_v18 = vpack.c.bf16 %v126_v17, %v125_v16  ;;  %v140_v21 = vpack.c.bf16 %v128_v20, %v127_v19  ;;  %v129_v22 = vld [vmem:[#allocation6 + $0x40] sm:$0xff]  ;;  %v130_v23 = vld [vmem:[#allocation6 + $0x48] sm:$0xff]  ;;  %v131_v25 = vld [vmem:[#allocation6 + $0x50] sm:$0xff] }
  0x2c   :  { %285 = vmatprep.subr.bf16.mxu1 %v392_v0  ;;  %v141_v24 = vpack.c.bf16 %v130_v23, %v129_v22  ;;  %v132_v26 = vld [vmem:[#allocation6 + $0x58] sm:$0xff]  ;;  %v133_v28 = vld [vmem:[#allocation6 + $0x60] sm:$0xff]  ;;  %v134_v29 = vld [vmem:[#allocation6 + $0x68] sm:$0xff] }
  0x2d   :  { %278 = vmatpush3.bf16.msra.mxu0 %v65_v9  ;;  %v142_v27 = vpack.c.bf16 %v132_v26, %v131_v25  ;;  %v143_v30 = vpack.c.bf16 %v134_v29, %v133_v28  ;;  %v135_v31 = vld [vmem:[#allocation6 + $0x70] sm:$0xff]  ;;  %v136_v32 = vld [vmem:[#allocation6 + $0x78] sm:$0xff]  ;;  %v258_v34 = vld [vmem:[%s494_s2] ss:$0 sm:$0xff] }
  0x2e   :  { %303 = vmatprep.subr.bf16.mxu0 %v392_v0  ;;  %v144_v33 = vpack.c.bf16 %v136_v32, %v135_v31  ;;  %v260_v44 = vld [vmem:[%s496_s4] ss:$0 sm:$0xff]  ;;  %s394_s4 = smov [#allocation8]  }
  0x2f   :  { %286 = vmatpush3.bf16.msra.mxu1 %v138_v14  ;;  %v195_v54 = vld [vmem:[%s497_s5] sm:$0x1]  ;;  %s248_s12 = sshll.u32 %s394_s4, 4  ;;  %s249_s12 = int_to_ptr.vmem [resolvable:$true] %s248_s12 }
  0x30   :  { %280 = vmatmul.mubr.msk.bf16.vlgmr.msra.gmra.mrb[0].mxu0 %vm73_vm1, %v59_v15  ;;  %287 = vmatprep.subr.bf16.mxu1 %v392_v0  ;;  %v196_v55 = vpack.c.bf16 %v195_v54, %v195_v54  ;;  %s360_s13 = scalar_lea.vmem %s249_s12, 16  ;;  %s364_s14 = scalar_lea.vmem %s249_s12, 32 }
  0x31   :  { %305 = vmatprep.mubr.msk.bf16.mxu0 %vm393_vm0, %v392_v0  ;;  %p361_p2 = scmp.ne.s32.totalorder %s249_s12, %s360_s13  ;;  %p365_p3 = scmp.lt.s32.totalorder %s249_s12, %s249_s12 }
  0x32   :  { %p366_p4 = scmp.lt.s32.totalorder %s364_s14, %s360_s13 }
  0x33   :  { %288 = vmatpush3.bf16.msra.mxu1 %v139_v18 }
  0x34   :  { %289 = vmatprep.subr.bf16.mxu1 %v392_v0  ;;  %p367_p5 = por %p366_p4, %p365_p3 }
  0x36   :  { %p368_p6 = pnand %p367_p5, %p361_p2 }
  0x37   :  { %290 = vmatpush3.bf16.msra.mxu1 %v140_v21 }
  0x38   :  { %291 = vmatprep.subr.bf16.mxu1 %v392_v0 }
  0x3b   :  { %292 = vmatpush3.bf16.msra.mxu1 %v141_v24 }
  0x3c   :  { %293 = vmatprep.subr.bf16.mxu1 %v392_v0 }
  0x3f   :  { %294 = vmatpush3.bf16.msra.mxu1 %v142_v27 }
  0x40   :  { %295 = vmatprep.subr.bf16.mxu1 %v392_v0 }
  0x43   :  { %296 = vmatpush3.bf16.msra.mxu1 %v143_v30 }
  0x44   :  { %297 = vmatprep.subr.bf16.mxu1 %v392_v0 }
  0x47   :  { %298 = vmatpush3.bf16.msra.mxu1 %v144_v33 }
 0x103   :  { %v111_v35 = vpop.f32.mrb[0].mxu0 }
 0x104   :  { %v112_v36 = vadd.f32 %v258_v34, %v111_v35  ;;  %v281_v37 = vpop.f32.mrb[1].mxu0 }
 0x105   :  { %v114_v38 = vpop.f32.mrb[2].mxu0 }
 0x106   :  { %v115_v39 = vadd.f32 %v258_v34, %v114_v38  ;;  %v282_v40 = vpop.f32.mrb[3].mxu0  ;;  %v118_v41 = vmax.f32 %v112_v36, 0.0 }
 0x108   :  { %v119_v42 = vmax.f32 %v115_v39, 0.0 }
 0x10a   :  { %v120_v43 = vpack.c.bf16 %v119_v42, %v118_v41 }
 0x10c   :  { %300 = vmatmul.mubr.bf16.vlgmr.msra.gmra.mrb[0].mxu1 %v120_v43 }
 0x1df   :  { %v186_v45 = vpop.f32.mrb[0].mxu1 }
 0x1e0   :  { %v187_v46 = vadd.f32 %v260_v44, %v186_v45  ;;  %v301_v47 = vpop.f32.mrb[1].mxu1 }
 0x1e1   :  { %v189_v48 = vpop.f32.mrb[2].mxu1 }
 0x1e2   :  { %v190_v49 = vadd.f32 %v260_v44, %v189_v48  ;;  %v302_v50 = vpop.f32.mrb[3].mxu1  ;;  %v193_v51 = vmax.f32 %v187_v46, 0.0 }
 0x1e4   :  { %v194_v52 = vmax.f32 %v190_v49, 0.0 }
 0x1e6   :  { %v197_v53 = vpack.c.bf16 %v194_v52, %v193_v51 }
 0x1e8   :  { %304 = vmatpush3.bf16.xpose.msra.mxu0 %v197_v53 }
 0x1ef   :  { %306 = vmatmul.mubr.bf16.vlgmr.msra.gmra.mrb[4].mxu0 %v196_v55 }
 0x2c2   :  { %v234_v57 = vpop.f32.mrb[4].mxu0 }
 0x2c3   :  { %v235_v58 = vadd.f32 %v234_v57, %v199_v56  ;;  %v307_v59 = vpop.f32.mrb[5].mxu0 }
 0x2c4   :  { %v237_v60 = vpop.f32.mrb[6].mxu0 }
 0x2c5   :  { %v308_v61 = vpop.f32.mrb[7].mxu0  ;;  %241 = vst.msk [vmem:[#allocation8] sm:$0x1] %vm240_vm2, %v235_v58 }
 0x2c6   :  { %371 = shalt.err (!%p368_p6)
}
 0x2c7   :  { %s372_s15 = scalar_lea.hbm %s499_s7, 16 }
 0x2c8   :  { %p373_p7 = scmp.ne.s32.totalorder %s499_s7, %s372_s15  ;;  %p376_p8 = scmp.lt.u32.totalorder %s372_s15, %s499_s7 }
 0x2ca   :  { %p378_p9 = pnand %p376_p8, %p373_p7 }
 0x2cc   :  { %381 = shalt.err (!%p378_p9)
}
 0x2cd   :  { %251 = dma.vmem_to_hbm [thread:$0]  %s249_s12, 16, %s499_s7, [#allocation5]  }
 0x2ce   :  { %386 = dma.done.wait [#allocation5], 16  }
 0x2cf   :  { %387 = vsyncadd [#allocation5], 4294967280 }
 0x2d0   :  { %255 = vsyncpa [#allocation4], 1 }
 0x2d1   :  { %256 = vsyncpa [#allocation7], 1 }
 0x2d2   :  { %257 = vsyncpa [#allocation5], 1 }

</bundles_post_ra>
